<compile_context>
chip_gen: v7x
topology: tpu7x:2x2x1
jax: 0.10.0
libtpu: 0.0.40
codegen_flags: <defaults>
</compile_context>

<pallas_src>
import jax
import jax.numpy as jnp
from jax.experimental import pallas as pl
from jax.experimental.pallas import tpu as pltpu

# Synthetic, deterministic "operation pool" of soft-logic elementwise binary ops
# (the PyTorch module takes the pool as a constructor arg; we fix 4 classic ones).
#   0: AND  = a*b
#   1: OR   = a + b - a*b
#   2: XOR  = a + b - 2*a*b
#   3: NAND = 1 - a*b
NUM_OPS = 4

LANES = 128
TARGET_BLOCK_BYTES = 2 * 1024 * 1024   # ~2 MiB per array per block (>= ~1 MiB HBM-BW knee)
SMALL_INPUT_BYTES = 256 * 1024         # below this, one block even on dual-TC chips
VMEM_LIMIT_BYTES = 32 * 1024 * 1024    # 3 arrays x 2 buffers x 2 MiB = 12 MiB << limit


def _round_up(x, m):
    return ((x + m - 1) // m) * m


def _cdiv(a, b):
    return (a + b - 1) // b


def _sublane_multiple(dtype):
    # Native tile is (8,128) 32-bit words; packed dtypes need proportionally more rows.
    return max(8, 32 // jnp.dtype(dtype).itemsize)


def _num_tensorcores(*arrays):
    """Best-effort TensorCore count of the device the inputs live on."""
    dev = None
    for x in arrays:
        try:
            ds = list(x.devices())
            if ds:
                dev = ds[0]
                break
        except Exception:
            pass
    if dev is None:
        try:
            dev = jax.devices()[0]
        except Exception:
            return 1
    kind = str(getattr(dev, "device_kind", "")).lower()
    if "v7" in kind:
        return 2
    nc = getattr(dev, "num_cores", None)
    try:
        return max(1, int(nc)) if nc is not None else 1
    except Exception:
        return 1


def logic_node_kernel(coef_ref, a_ref, b_ref, o_ref):
    """out = c0 + ca*(a+b) + cab*(a*b); coefficients scalar-prefetched into SMEM."""
    c0 = coef_ref[0]
    ca = coef_ref[1]
    cab = coef_ref[2]
    a = a_ref[...].astype(jnp.float32)
    b = b_ref[...].astype(jnp.float32)
    out = c0 + ca * (a + b) + cab * (a * b)
    o_ref[...] = out.astype(o_ref.dtype)


def logic_node_forward(input_1, input_2, logits, *, sample_path=True, key=None):
    """Forward pass of LogicNode.

    Mirrors LogicNodeFunction.forward:
      - sample op index from Categorical(logits) if sample_path else argmax
      - apply operation_pool[idx](input_1, input_2) elementwise (in Pallas)
    (log_probs are only used in backward; not needed for forward output.)
    """
    assert input_1.shape == input_2.shape
    assert input_1.dtype == input_2.dtype
    if sample_path:
        assert key is not None
        op_idx = jax.random.categorical(key, logits)
    else:
        op_idx = jnp.argmax(logits, axis=-1)
    op_idx = jnp.asarray(op_idx, jnp.int32)

    # Hoisted coefficient selection (tiny gather outside the kernel):
    #   out = c0 + ca*(a+b) + cab*(a*b)
    #   AND: (0,0, 1)  OR: (0,1,-1)  XOR: (0,1,-2)  NAND: (1,0,-1)
    coef_table = jnp.array(
        [[0.0, 0.0, 1.0],
         [0.0, 1.0, -1.0],
         [0.0, 1.0, -2.0],
         [1.0, 0.0, -1.0]], dtype=jnp.float32)
    coefs = coef_table[op_idx]                         # f32[3], scalar-prefetched

    orig_shape = input_1.shape
    orig_dtype = input_1.dtype
    flat = int(input_1.size)
    itemsize = jnp.dtype(orig_dtype).itemsize
    sub = _sublane_multiple(orig_dtype)

    # Pad only up to one native (sub,128) tile; zero pad for aligned sizes.
    rows = _round_up(max(1, _cdiv(flat, LANES)), sub)
    pad = rows * LANES - flat

    # HBM-bandwidth-bound kernel: ~2 MiB blocks, partial last block instead of
    # rounding rows up to a tm multiple.
    tm_max = max(sub, (TARGET_BLOCK_BYTES // (LANES * itemsize)) // sub * sub)
    num_tc = _num_tensorcores(input_1, input_2)
    if num_tc <= 1 or rows * LANES * itemsize <= SMALL_INPUT_BYTES:
        tm = min(rows, tm_max)
    else:
        # dual-TC (v7x): even number of blocks >= 2 so both cores stream HBM.
        n = _round_up(max(2, _cdiv(rows, tm_max)), 2)
        tm = min(_round_up(_cdiv(rows, n), sub), tm_max, rows)
    grid = _cdiv(rows, tm)

    a = input_1.reshape(-1)
    b = input_2.reshape(-1)
    if pad:
        a = jnp.pad(a, (0, pad))
        b = jnp.pad(b, (0, pad))
    a2 = a.reshape(rows, LANES)
    b2 = b.reshape(rows, LANES)

    out2 = pl.pallas_call(
        logic_node_kernel,
        out_shape=jax.ShapeDtypeStruct((rows, LANES), orig_dtype),
        grid_spec=pltpu.PrefetchScalarGridSpec(
            num_scalar_prefetch=1,
            grid=(grid,),
            in_specs=[
                pl.BlockSpec((tm, LANES), lambda i, c: (i, 0)),
                pl.BlockSpec((tm, LANES), lambda i, c: (i, 0)),
            ],
            out_specs=pl.BlockSpec((tm, LANES), lambda i, c: (i, 0)),
        ),
        compiler_params=pltpu.CompilerParams(
            dimension_semantics=("parallel",),
            vmem_limit_bytes=VMEM_LIMIT_BYTES),
    )(coefs, a2, b2)

    out = out2.reshape(-1)
    if pad:
        out = out[:flat]
    return out.reshape(orig_shape)


def reference_forward(input_1, input_2, op_idx):
    a = input_1.astype(jnp.float32)
    b = input_2.astype(jnp.float32)
    ab = a * b
    ops = [ab, a + b - ab, a + b - 2.0 * ab, 1.0 - ab]
    return jnp.stack(ops, 0)[op_idx].astype(input_1.dtype)


if __name__ == "__main__":
    key = jax.random.PRNGKey(0)
    k1, k2, k_sample = jax.random.split(key, 3)

    # small shapes consistent with the module (elementwise on two tensors)
    B, C, H, W = 2, 4, 16, 16
    x1 = jax.random.uniform(k1, (B, C, H, W), dtype=jnp.float32)  # soft-boolean activations
    x2 = jax.random.uniform(k2, (B, C, H, W), dtype=jnp.float32)

    # nn.Parameter(torch.zeros(len(operation_pool)))
    logits = jnp.zeros((NUM_OPS,), dtype=jnp.float32)
    # TODO(synk): module's self.index_1 / self.index_2 are unused in forward(); omitted.

    # sample_path=True branch (deterministic via PRNGKey)
    out = logic_node_forward(x1, x2, logits, sample_path=True, key=k_sample)
    jax.block_until_ready(out)

    # also exercise the argmax branch (sample_path=False)
    out_greedy = logic_node_forward(x1, x2, logits, sample_path=False)
    jax.block_until_ready(out_greedy)

    # check against pure-JAX reference
    op_idx_sampled = jax.random.categorical(k_sample, logits)
    ref = reference_forward(x1, x2, op_idx_sampled)
    ref_greedy = reference_forward(x1, x2, jnp.argmax(logits))
    assert jnp.allclose(out, ref, atol=1e-6)
    assert jnp.allclose(out_greedy, ref_greedy, atol=1e-6)

    # non-aligned shape: exercises the <=1-tile pad + partial-last-block path
    k3, k4, k5 = jax.random.split(k_sample, 3)
    y1 = jax.random.uniform(k3, (3, 5, 17, 31), dtype=jnp.float32)   # 7905 elems, not /128
    y2 = jax.random.uniform(k4, (3, 5, 17, 31), dtype=jnp.float32)
    out_big = logic_node_forward(y1, y2, logits, sample_path=True, key=k5)
    jax.block_until_ready(out_big)
    ref_big = reference_forward(y1, y2, jax.random.categorical(k5, logits))
    assert jnp.allclose(out_big, ref_big, atol=1e-6)

    # bf16 path: native (16,128)-multiple tiles, f32 compute in-kernel
    z1 = jax.random.uniform(k1, (4, 8, 32, 32), dtype=jnp.float32).astype(jnp.bfloat16)
    z2 = jax.random.uniform(k2, (4, 8, 32, 32), dtype=jnp.float32).astype(jnp.bfloat16)
    out_bf16 = logic_node_forward(z1, z2, logits, sample_path=True, key=k5)
    jax.block_until_ready(out_bf16)
    ref_bf16 = reference_forward(z1, z2, jax.random.categorical(k5, logits))
    assert jnp.allclose(out_bf16.astype(jnp.float32),
                        ref_bf16.astype(jnp.float32), atol=2e-2)

    print("KERNEL_OK")
</pallas_src>

<mosaic_0001>
module attributes {stable_mosaic.version = 11 : i64} {
  func.func @logic_node_kernel(%arg0: i32, %arg1: memref<3xf32, #tpu.memory_space<smem>>, %arg2: memref<16x128xf32, #tpu.memory_space<vmem>>, %arg3: memref<16x128xf32, #tpu.memory_space<vmem>>, %arg4: memref<16x128xf32, #tpu.memory_space<vmem>>) attributes {dimension_semantics = [#tpu.dimension_semantics<parallel>], iteration_bounds = array<i64: 1>, scalar_prefetch = 1 : i64, scratch_operands = 0 : i64, tpu.core_type = #tpu.core_type<tc>, window_params = [{transform_indices = @transform_0, window_bounds = array<i64: 16, 128>}, {transform_indices = @transform_1, window_bounds = array<i64: 16, 128>}, {transform_indices = @transform_2, window_bounds = array<i64: 16, 128>}]} {
    %c0 = arith.constant 0 : index
    %0 = memref.load %arg1[%c0] : memref<3xf32, #tpu.memory_space<smem>>
    %c1 = arith.constant 1 : index
    %1 = memref.load %arg1[%c1] : memref<3xf32, #tpu.memory_space<smem>>
    %c2 = arith.constant 2 : index
    %2 = memref.load %arg1[%c2] : memref<3xf32, #tpu.memory_space<smem>>
    %c0_0 = arith.constant 0 : index
    %c0_1 = arith.constant 0 : index
    %3 = vector.load %arg2[%c0_0, %c0_1] : memref<16x128xf32, #tpu.memory_space<vmem>>, vector<16x128xf32>
    %c0_2 = arith.constant 0 : index
    %c0_3 = arith.constant 0 : index
    %4 = vector.load %arg3[%c0_2, %c0_3] : memref<16x128xf32, #tpu.memory_space<vmem>>, vector<16x128xf32>
    %5 = arith.addf %3, %4 : vector<16x128xf32>
    %6 = vector.broadcast %1 : f32 to vector<16x128xf32>
    %7 = arith.mulf %6, %5 : vector<16x128xf32>
    %8 = vector.broadcast %0 : f32 to vector<16x128xf32>
    %9 = arith.addf %8, %7 : vector<16x128xf32>
    %10 = arith.mulf %3, %4 : vector<16x128xf32>
    %11 = vector.broadcast %2 : f32 to vector<16x128xf32>
    %12 = arith.mulf %11, %10 : vector<16x128xf32>
    %13 = arith.addf %9, %12 : vector<16x128xf32>
    %c0_4 = arith.constant 0 : index
    %c0_5 = arith.constant 0 : index
    %14 = vector.load %arg4[%c0_4, %c0_5] : memref<16x128xf32, #tpu.memory_space<vmem>>, vector<16x128xf32>
    tpu.vector_store %arg4[%c0_4, %c0_5], %13 {strides = array<i32>} : memref<16x128xf32, #tpu.memory_space<vmem>>, vector<16x128xf32>,
    return
  }
  func.func @transform_0(%arg0: i32, %arg1: memref<3xf32, #tpu.memory_space<smem>>) -> (i32, i32) {
    %c0_i32 = arith.constant 0 : i32
    %c0_i32_0 = arith.constant 0 : i32
    return %arg0, %c0_i32 : i32, i32
  }
  func.func @transform_1(%arg0: i32, %arg1: memref<3xf32, #tpu.memory_space<smem>>) -> (i32, i32) {
    %c0_i32 = arith.constant 0 : i32
    %c0_i32_0 = arith.constant 0 : i32
    return %arg0, %c0_i32 : i32, i32
  }
  func.func @transform_2(%arg0: i32, %arg1: memref<3xf32, #tpu.memory_space<smem>>) -> (i32, i32) {
    %c0_i32 = arith.constant 0 : i32
    %c0_i32_0 = arith.constant 0 : i32
    return %arg0, %c0_i32 : i32, i32
  }
}

</mosaic_0001>

<bundles_post_ra>
// kernel: tpu_custom_call.1
= control target key start
LH: loop header
LB: loop body
LE: loop exit
PB: predicated region body
PF: predicated region fallthrough
CT: control target
= control target key end

     0   :  { %s262_s0 = inlined_call_operand.hbm [shape: f32[3], index: 0, kind: input, shape index: {}]   ;;  %s263_s1 = inlined_call_operand.hbm [shape: f32[16,128], index: 1, kind: input, shape index: {}]   ;;  %s264_s2 = inlined_call_operand.hbm [shape: f32[16,128], index: 2, kind: input, shape index: {}]   ;;  %s265_s3 = inlined_call_operand.hbm [shape: f32[16,128], index: 3, kind: output, shape index: {}]  }
   0x1   :  { %s95_s14 = scalar_lea.hbm %s262_s0, 16 }
   0x2   :  { %p96_p0 = scmp.ne.s32.totalorder %s262_s0, %s95_s14  ;;  %p99_p1 = scmp.lt.u32.totalorder %s95_s14, %s262_s0 }
   0x4   :  { %p101_p2 = pnand %p99_p1, %p96_p0 }
   0x6   :  { %104 = shalt.err (!%p101_p2)  }
   0x7   :  { %s179_s19 = smov [#allocation3]  }
   0x8   :  { %9 = dma.hbm_to_smem %s262_s0, 16, %s179_s19, [#allocation2] }
   0x9   :  { %171 = dma.done.wait [#allocation2], 16 }
   0xa   :  { %172 = vsyncadd [#allocation2], 4294967280 }
   0xb   :  { %11 = sfence }
   0xc   :  { %12 = vsyncpa [#allocation5], 0 }
   0xd   :  { %13 = vsyncpa [#allocation8], 0 }
   0xe   :  { %14 = vsyncpa [#allocation6], 0  ;;  %s180_s22 = smov [#allocation4]   ;;  %s105_s26 = scalar_lea.hbm %s263_s1, 256 }
   0xf   :  { %s20_s23 = sshll.u32 %s180_s22, 4  ;;  %p106_p3 = scmp.ne.s32.totalorder %s263_s1, %s105_s26  ;;  %s21_s23 = int_to_ptr.vmem [resolvable:$true] %s20_s23 }
  0x10   :  { %p109_p4 = scmp.lt.u32.totalorder %s105_s26, %s263_s1 }
  0x12   :  { %p111_p5 = pnand %p109_p4, %p106_p3 }
  0x14   :  { %114 = shalt.err (!%p111_p5)
}
  0x15   :  { %s115_s0 = scalar_lea.vmem %s21_s23, 256  ;;  %p120_p7 = scmp.lt.s32.totalorder %s21_s23, %s21_s23 }
  0x16   :  { %p116_p6 = scmp.ne.s32.totalorder %s21_s23, %s115_s0  ;;  %p121_p8 = scmp.lt.s32.totalorder %s115_s0, %s115_s0 }
  0x18   :  { %p122_p9 = por %p121_p8, %p120_p7 }
  0x1a   :  { %p123_p10 = pnand %p122_p9, %p116_p6 }
  0x1c   :  { %126 = shalt.err (!%p123_p10)
}
  0x1d   :  { %s181_s4 = smov 128   ;;  %s182_s5 = smov 8  }
  0x1e   :  { %26 = dma.hbm_to_vmem [thread:$0]  %s263_s1, 256, %s21_s23, [#allocation5], %s181_s4, %s181_s4, %s182_s5  }
  0x1f   :  { %s183_s8 = smov [#allocation7]   ;;  %s127_s12 = scalar_lea.hbm %s264_s2, 256 }
  0x20   :  { %s32_s9 = sshll.u32 %s183_s8, 4  ;;  %p128_p11 = scmp.ne.s32.totalorder %s264_s2, %s127_s12  ;;  %s33_s9 = int_to_ptr.vmem [resolvable:$true] %s32_s9 }
  0x21   :  { %p131_p12 = scmp.lt.u32.totalorder %s127_s12, %s264_s2 }
  0x23   :  { %p133_p13 = pnand %p131_p12, %p128_p11 }
  0x25   :  { %136 = shalt.err (!%p133_p13)
}
  0x26   :  { %s137_s17 = scalar_lea.vmem %s33_s9, 256  ;;  %p142_p1 = scmp.lt.s32.totalorder %s33_s9, %s33_s9 }
  0x27   :  { %p138_p0 = scmp.ne.s32.totalorder %s33_s9, %s137_s17  ;;  %p143_p2 = scmp.lt.s32.totalorder %s137_s17, %s137_s17 }
  0x29   :  { %p144_p3 = por %p143_p2, %p142_p1 }
  0x2b   :  { %p145_p4 = pnand %p144_p3, %p138_p0 }
  0x2d   :  { %148 = shalt.err (!%p145_p4)
}
  0x2e   :  { %38 = dma.hbm_to_vmem [thread:$0]  %s264_s2, 256, %s33_s9, [#allocation8], %s181_s4, %s181_s4, %s182_s5  }
  0x2f   :  { %173 = dma.done.wait [#allocation5], 256  }
  0x30   :  { %174 = vsyncadd [#allocation5], 4294967040 }
  0x31   :  { %175 = dma.done.wait [#allocation8], 256  }
  0x32   :  { %176 = vsyncadd [#allocation8], 4294967040  ;;  %s45_s19 = sld [smem:[#allocation3]]  ;;  %s87_s20 = sld [smem:[#allocation3 + $0x1]]  ;;  %v48_v0 = vld [vmem:[#allocation4] sm:$0xff]  ;;  %v50_v1 = vld [vmem:[#allocation7] sm:$0xff] }
  0x33   :  { %s88_s21 = sld [smem:[#allocation3 + $0x2]]  ;;  %v49_v3 = vld [vmem:[#allocation4 + $0x8] sm:$0xff]  ;;  %v52_v4 = vadd.f32 %v50_v1, %v48_v0  ;;  %v60_v5 = vmul.f32 %v50_v1, %v48_v0  ;;  %v51_v7 = vld [vmem:[#allocation7 + $0x8] sm:$0xff]  ;;  %s184_s2 = smov [#allocation9]  }
  0x34   :  { %v53_v9 = vadd.f32 %v51_v7, %v49_v3  ;;  %v61_v10 = vmul.f32 %v51_v7, %v49_v3  ;;  %s74_s22 = sshll.u32 %s184_s2, 4  ;;  %s75_s22 = int_to_ptr.vmem [resolvable:$true] %s74_s22 }
  0x35   :  { %s149_s23 = scalar_lea.vmem %s75_s22, 256  ;;  %p154_p6 = scmp.lt.s32.totalorder %s75_s22, %s75_s22 }
  0x36   :  { %p150_p5 = scmp.ne.s32.totalorder %s75_s22, %s149_s23  ;;  %p155_p7 = scmp.lt.s32.totalorder %s149_s23, %s149_s23 }
  0x38   :  { %v54_v2 = vstv %s87_s20  ;;  %v57_v8 = vstv %s45_s19  ;;  %p156_p8 = por %p155_p7, %p154_p6 }
  0x39   :  { %v62_v6 = vstv %s88_s21  ;;  %v55_v11 = vmul.f32 %v54_v2, %v52_v4  ;;  %v56_v13 = vmul.f32 %v54_v2, %v53_v9 }
  0x3a   :  { %v63_v12 = vmul.f32 %v62_v6, %v60_v5  ;;  %v64_v14 = vmul.f32 %v62_v6, %v61_v10  ;;  %p157_p9 = pnand %p156_p8, %p150_p5 }
  0x3b   :  { %v58_v15 = vadd.f32 %v57_v8, %v55_v11  ;;  %v59_v16 = vadd.f32 %v57_v8, %v56_v13 }
  0x3d   :  { %v65_v17 = vadd.f32 %v63_v12, %v58_v15  ;;  %v66_v18 = vadd.f32 %v64_v14, %v59_v16 }
  0x3f   :  { %67 = vst [vmem:[#allocation9] sm:$0xff] %v65_v17  ;;  %68 = vst [vmem:[#allocation9 + $0x8] sm:$0xff] %v66_v18 }
  0x40   :  { %160 = shalt.err (!%p157_p9)
}
  0x41   :  { %s161_s26 = scalar_lea.hbm %s265_s3, 256 }
  0x42   :  { %p162_p10 = scmp.ne.s32.totalorder %s265_s3, %s161_s26  ;;  %p165_p11 = scmp.lt.u32.totalorder %s161_s26, %s265_s3 }
  0x44   :  { %p167_p12 = pnand %p165_p11, %p162_p10 }
  0x46   :  { %170 = shalt.err (!%p167_p12)
}
  0x47   :  { %80 = dma.vmem_to_hbm [thread:$0]  %s75_s22, 256, %s265_s3, [#allocation6], %s181_s4, %s181_s4, %s182_s5  }
  0x48   :  { %177 = dma.done.wait [#allocation6], 256  }
  0x49   :  { %178 = vsyncadd [#allocation6], 4294967040 }
  0x4a   :  { %84 = vsyncpa [#allocation5], 1 }
  0x4b   :  { %85 = vsyncpa [#allocation8], 1 }
  0x4c   :  { %86 = vsyncpa [#allocation6], 1 }

</bundles_post_ra>
